<compile_context>
chip_gen: v5e
topology: v5e:2x2
jax: 0.10.0
libtpu: 0.0.40
codegen_flags: <defaults>
</compile_context>

<pallas_src>
import jax
import jax.numpy as jnp
from jax import lax
from jax.experimental import pallas as pl
from jax.experimental.pallas import tpu as pltpu


def _residual_stack_kernel(x_ref, w1_ref, w2_ref, o_ref):
    """One block of batch rows per grid step.

    x_ref : (B_blk, L, C)           input block, NLC layout
    w1_ref: (num_layers, 3*C, Rh)   fused k=3 conv weights (tap-major rows)
    w2_ref: (num_layers, Rh, C)     k=1 conv weights, (in, out)
    o_ref : (B_blk, L, C)           output block
    """
    b_blk, L, C = x_ref.shape
    num_layers = w1_ref.shape[0]
    M = b_blk * L

    # Fold batch into the matmul M dimension: (B_blk, L, C) -> (M, C).
    x = x_ref[...].astype(jnp.float32).reshape(M, C)

    # Boundary masks, hoisted out of the layer loop.  Rolling the packed
    # (M, C) slab wraps across sequence boundaries, but exactly those rows are
    # the zero-padding rows of the k=3 / padding=1 conv, so masking them to 0
    # restores per-sequence correctness.
    row = lax.broadcasted_iota(jnp.int32, (M, 1), 0)
    pos = lax.rem(row, L)
    is_first = pos == 0
    is_last = pos == L - 1

    for layer in range(num_layers):  # static unroll over residual layers
        h = jnp.maximum(x, 0.0)  # ReLU
        # Zero-padded shifts (padding=1).  pltpu.roll requires shift >= 0, so
        # the "-1" shift is the cyclic shift by M-1.
        h_prev = jnp.where(is_first, 0.0, pltpu.roll(h, shift=1, axis=0))
        h_next = jnp.where(is_last, 0.0, pltpu.roll(h, shift=M - 1, axis=0))
        # Fused k=3 conv: one K=3C matmul instead of three K=C matmuls.
        h_cat = jnp.concatenate([h_prev, h, h_next], axis=-1)  # (M, 3C)
        y = jnp.dot(h_cat.astype(w1_ref.dtype), w1_ref[layer],
                    preferred_element_type=jnp.float32)
        y = jnp.maximum(y, 0.0)  # ReLU
        # 1x1 conv == plain matmul; residual add in f32.
        x = x + jnp.dot(y.astype(w2_ref.dtype), w2_ref[layer],
                        preferred_element_type=jnp.float32)

    # Final F.relu on the stack output.
    o_ref[...] = jnp.maximum(x, 0.0).reshape(b_blk, L, C).astype(o_ref.dtype)


def residual_stack_pallas_nlc(x_nlc, w1_all, w2_all, *,
                              compute_dtype=jnp.float32, target_rows=256):
    """Hot path: NLC layout, no wrapper transposes.

    x_nlc : (N, L, C) float32
    w1_all: (num_layers, 3, C, Rh)   per-tap k=3 weights (y += x[l-1+t] @ w1[t])
    w2_all: (num_layers, Rh, C)
    compute_dtype: MXU operand dtype (jnp.bfloat16 recommended on v6e/v7x);
                   accumulation and residual/ReLU math stay f32.
    target_rows: desired matmul M per grid step (B_blk*L); also bounds the
                 live vreg set (keep target_rows*C modest to avoid spills).
    """
    N, L, C = x_nlc.shape
    num_layers, _, _, Rh = w1_all.shape

    # Fuse the three taps into one (3C, Rh) weight per layer; row order
    # [tap -1 | tap 0 | tap +1] matches the [h_prev, h, h_next] lane concat.
    # Also flattens the (C, Rh) trailing dims into (3C, Rh) to cut tile
    # padding, and casts the MXU operands to the compute dtype.
    w1_fused = w1_all.reshape(num_layers, 3 * C, Rh).astype(compute_dtype)
    w2_cast = w2_all.astype(compute_dtype)

    # Fold batch rows into each grid step so M = B_blk*L is a healthy multiple
    # of the MXU height; pad the batch to a whole number of blocks (padded
    # rows are zeros and are sliced off afterwards).
    b_blk = max(1, min(N, max(1, target_rows // L)))
    n_blocks = pl.cdiv(N, b_blk)
    n_pad = n_blocks * b_blk
    if n_pad != N:
        x_nlc = jnp.pad(x_nlc, ((0, n_pad - N), (0, 0), (0, 0)))

    out_nlc = pl.pallas_call(
        _residual_stack_kernel,
        out_shape=jax.ShapeDtypeStruct((n_pad, L, C), x_nlc.dtype),
        grid_spec=pltpu.PrefetchScalarGridSpec(
            num_scalar_prefetch=0,
            grid=(n_blocks,),
            in_specs=[
                pl.BlockSpec((b_blk, L, C), lambda b: (b, 0, 0)),
                pl.BlockSpec(w1_fused.shape, lambda b: (0, 0, 0)),
                pl.BlockSpec(w2_cast.shape, lambda b: (0, 0, 0)),
            ],
            out_specs=pl.BlockSpec((b_blk, L, C), lambda b: (b, 0, 0)),
        ),
        compiler_params=pltpu.CompilerParams(
            dimension_semantics=("parallel",)),
    )(x_nlc, w1_fused, w2_cast)

    return out_nlc[:N] if n_pad != N else out_nlc


def residual_stack_pallas(x_ncl, w1_all, w2_all, **kwargs):
    """NCL convenience wrapper (PyTorch layout).

    In production keep the surrounding model in NLC and call
    residual_stack_pallas_nlc directly; these transposes exist only to match
    the torch (N, C, L) interface.
    """
    x_nlc = jnp.transpose(x_ncl, (0, 2, 1))           # (N, L, C)
    out_nlc = residual_stack_pallas_nlc(x_nlc, w1_all, w2_all, **kwargs)
    return jnp.transpose(out_nlc, (0, 2, 1))          # back to (N, C, L)


def residual_stack_ref(x_ncl, w1_all, w2_all):
    """Pure-JAX reference mirroring the PyTorch forward exactly (NCL)."""
    num_layers = w1_all.shape[0]
    x = x_ncl
    dn = ('NCH', 'OIH', 'NCH')
    for layer in range(num_layers):
        # torch Conv1d weight layout: (out, in, k); ours is (k, in, out)
        w1_t = jnp.transpose(w1_all[layer], (2, 1, 0))           # (Rh, C, 3)
        w2_t = jnp.transpose(w2_all[layer], (1, 0))[:, :, None]  # (C, Rh, 1)
        h = jax.nn.relu(x)
        h = lax.conv_general_dilated(h, w1_t, window_strides=(1,),
                                     padding=[(1, 1)], dimension_numbers=dn)
        h = jax.nn.relu(h)
        h = lax.conv_general_dilated(h, w2_t, window_strides=(1,),
                                     padding=[(0, 0)], dimension_numbers=dn)
        x = x + h
    return jax.nn.relu(x)


if __name__ == "__main__":
    NUM_LAYERS = 2   # num_residual_layers
    C = 32           # in_channels == num_hiddens (required for residual add)
    RH = 16          # num_residual_hiddens
    L = 16           # sequence length

    key = jax.random.PRNGKey(0)
    kx, kw1, kw2 = jax.random.split(key, 3)
    w1_all = 0.1 * jax.random.normal(kw1, (NUM_LAYERS, 3, C, RH), dtype=jnp.float32)
    w2_all = 0.1 * jax.random.normal(kw2, (NUM_LAYERS, RH, C), dtype=jnp.float32)

    # Base config (N=2) plus a config that exercises batch folding, multiple
    # grid blocks, and batch padding (N=20 -> B_blk=16, 2 blocks, 12 pad rows).
    for N in (2, 20):
        x = jax.random.normal(kx, (N, C, L), dtype=jnp.float32)
        ref = residual_stack_ref(x, w1_all, w2_all)

        # f32 MXU operands (default).
        out = residual_stack_pallas(x, w1_all, w2_all)
        out = jax.block_until_ready(out)
        assert out.shape == (N, C, L)
        assert jnp.allclose(out, ref, atol=1e-4, rtol=1e-4), "f32 mismatch vs reference"

        # bf16 MXU operands (v6e/v7x feedback); f32 accumulation + residual.
        out_bf = residual_stack_pallas(x, w1_all, w2_all, compute_dtype=jnp.bfloat16)
        out_bf = jax.block_until_ready(out_bf)
        assert jnp.allclose(out_bf, ref, atol=8e-2, rtol=8e-2), "bf16 mismatch vs reference"

    print("KERNEL_OK")
</pallas_src>

<mosaic_0001>
module attributes {stable_mosaic.version = 11 : i64} {
  func.func @_residual_stack_kernel(%arg0: i32, %arg1: memref<2x16x32xf32, #tpu.memory_space<vmem>>, %arg2: memref<2x96x16xf32, #tpu.memory_space<vmem>>, %arg3: memref<2x16x32xf32, #tpu.memory_space<vmem>>, %arg4: memref<2x16x32xf32, #tpu.memory_space<vmem>>) attributes {dimension_semantics = [#tpu.dimension_semantics<parallel>], iteration_bounds = array<i64: 1>, scalar_prefetch = 0 : i64, scratch_operands = 0 : i64, tpu.core_type = #tpu.core_type<tc>, window_params = [{transform_indices = @transform_0, window_bounds = array<i64: 2, 16, 32>}, {pipeline_mode = #tpu.pipeline_mode<synchronous>, transform_indices = @transform_1, window_bounds = array<i64: 2, 96, 16>}, {pipeline_mode = #tpu.pipeline_mode<synchronous>, transform_indices = @transform_2, window_bounds = array<i64: 2, 16, 32>}, {transform_indices = @transform_3, window_bounds = array<i64: 2, 16, 32>}]} {
    %c0 = arith.constant 0 : index
    %c0_0 = arith.constant 0 : index
    %c0_1 = arith.constant 0 : index
    %0 = vector.load %arg1[%c0, %c0_0, %c0_1] : memref<2x16x32xf32, #tpu.memory_space<vmem>>, vector<2x16x32xf32>
    %1 = vector.shape_cast %0 : vector<2x16x32xf32> to vector<32x32xf32>
    %2 = tpu.iota {dimensions = array<i32: 0>} : vector<32x1xi32>
    %c16_i32 = arith.constant 16 : i32
    %3 = vector.broadcast %c16_i32 : i32 to vector<32x1xi32>
    %4 = arith.remsi %2, %3 : vector<32x1xi32>
    %c0_i32 = arith.constant 0 : i32
    %5 = vector.broadcast %c0_i32 : i32 to vector<32x1xi32>
    %6 = arith.cmpi eq, %4, %5 : vector<32x1xi32>
    %c15_i32 = arith.constant 15 : i32
    %7 = vector.broadcast %c15_i32 : i32 to vector<32x1xi32>
    %8 = arith.cmpi eq, %4, %7 : vector<32x1xi32>
    %cst = arith.constant 0.000000e+00 : f32
    %9 = vector.broadcast %cst : f32 to vector<32x32xf32>
    %10 = arith.maximumf %1, %9 : vector<32x32xf32>
    %c1_i32 = arith.constant 1 : i32
    %11 = tpu.dynamic_rotate %10 by %c1_i32 dim 0 : vector<32x32xf32>, i32 -> vector<32x32xf32>
    %cst_2 = arith.constant 0.000000e+00 : f32
    %12 = vector.shape_cast %6 : vector<32x1xi1> to vector<32x1xi1>
    %13 = vector.broadcast %12 : vector<32x1xi1> to vector<32x32xi1>
    %14 = vector.broadcast %cst_2 : f32 to vector<32x32xf32>
    %15 = arith.select %13, %14, %11 : vector<32x32xi1>, vector<32x32xf32>
    %c31_i32 = arith.constant 31 : i32
    %16 = tpu.dynamic_rotate %10 by %c31_i32 dim 0 : vector<32x32xf32>, i32 -> vector<32x32xf32>
    %cst_3 = arith.constant 0.000000e+00 : f32
    %17 = vector.shape_cast %8 : vector<32x1xi1> to vector<32x1xi1>
    %18 = vector.broadcast %17 : vector<32x1xi1> to vector<32x32xi1>
    %19 = vector.broadcast %cst_3 : f32 to vector<32x32xf32>
    %20 = arith.select %18, %19, %16 : vector<32x32xi1>, vector<32x32xf32>
    %21 = tpu.concatenate %15, %10, %20 in 1 : vector<32x32xf32>, vector<32x32xf32>, vector<32x32xf32> -> vector<32x96xf32>
    %c0_4 = arith.constant 0 : index
    %c0_5 = arith.constant 0 : index
    %c0_6 = arith.constant 0 : index
    %22 = vector.load %arg2[%c0_4, %c0_5, %c0_6] : memref<2x96x16xf32, #tpu.memory_space<vmem>>, vector<1x96x16xf32>
    %23 = vector.shape_cast %22 : vector<1x96x16xf32> to vector<96x16xf32>
    %cst_7 = arith.constant dense<0.000000e+00> : vector<32x16xf32>
    %24 = tpu.matmul %21, %23, %cst_7 {dimension_numbers = #tpu.dot_dimension_numbers<[1], [0], [0], [1], [0, 0, 1, 1], [], []>} : vector<32x96xf32>, vector<96x16xf32>, vector<32x16xf32> -> vector<32x16xf32>
    %cst_8 = arith.constant 0.000000e+00 : f32
    %25 = vector.broadcast %cst_8 : f32 to vector<32x16xf32>
    %26 = arith.maximumf %24, %25 : vector<32x16xf32>
    %c0_9 = arith.constant 0 : index
    %c0_10 = arith.constant 0 : index
    %c0_11 = arith.constant 0 : index
    %27 = vector.load %arg3[%c0_9, %c0_10, %c0_11] : memref<2x16x32xf32, #tpu.memory_space<vmem>>, vector<1x16x32xf32>
    %28 = vector.shape_cast %27 : vector<1x16x32xf32> to vector<16x32xf32>
    %cst_12 = arith.constant dense<0.000000e+00> : vector<32x32xf32>
    %29 = tpu.matmul %26, %28, %cst_12 {dimension_numbers = #tpu.dot_dimension_numbers<[1], [0], [0], [1], [0, 0, 1, 1], [], []>} : vector<32x16xf32>, vector<16x32xf32>, vector<32x32xf32> -> vector<32x32xf32>
    %30 = arith.addf %1, %29 : vector<32x32xf32>
    %cst_13 = arith.constant 0.000000e+00 : f32
    %31 = vector.broadcast %cst_13 : f32 to vector<32x32xf32>
    %32 = arith.maximumf %30, %31 : vector<32x32xf32>
    %c1_i32_14 = arith.constant 1 : i32
    %33 = tpu.dynamic_rotate %32 by %c1_i32_14 dim 0 : vector<32x32xf32>, i32 -> vector<32x32xf32>
    %cst_15 = arith.constant 0.000000e+00 : f32
    %34 = vector.shape_cast %6 : vector<32x1xi1> to vector<32x1xi1>
    %35 = vector.broadcast %34 : vector<32x1xi1> to vector<32x32xi1>
    %36 = vector.broadcast %cst_15 : f32 to vector<32x32xf32>
    %37 = arith.select %35, %36, %33 : vector<32x32xi1>, vector<32x32xf32>
    %c31_i32_16 = arith.constant 31 : i32
    %38 = tpu.dynamic_rotate %32 by %c31_i32_16 dim 0 : vector<32x32xf32>, i32 -> vector<32x32xf32>
    %cst_17 = arith.constant 0.000000e+00 : f32
    %39 = vector.shape_cast %8 : vector<32x1xi1> to vector<32x1xi1>
    %40 = vector.broadcast %39 : vector<32x1xi1> to vector<32x32xi1>
    %41 = vector.broadcast %cst_17 : f32 to vector<32x32xf32>
    %42 = arith.select %40, %41, %38 : vector<32x32xi1>, vector<32x32xf32>
    %43 = tpu.concatenate %37, %32, %42 in 1 : vector<32x32xf32>, vector<32x32xf32>, vector<32x32xf32> -> vector<32x96xf32>
    %c1 = arith.constant 1 : index
    %c0_18 = arith.constant 0 : index
    %c0_19 = arith.constant 0 : index
    %44 = vector.load %arg2[%c1, %c0_18, %c0_19] : memref<2x96x16xf32, #tpu.memory_space<vmem>>, vector<1x96x16xf32>
    %45 = vector.shape_cast %44 : vector<1x96x16xf32> to vector<96x16xf32>
    %cst_20 = arith.constant dense<0.000000e+00> : vector<32x16xf32>
    %46 = tpu.matmul %43, %45, %cst_20 {dimension_numbers = #tpu.dot_dimension_numbers<[1], [0], [0], [1], [0, 0, 1, 1], [], []>} : vector<32x96xf32>, vector<96x16xf32>, vector<32x16xf32> -> vector<32x16xf32>
    %cst_21 = arith.constant 0.000000e+00 : f32
    %47 = vector.broadcast %cst_21 : f32 to vector<32x16xf32>
    %48 = arith.maximumf %46, %47 : vector<32x16xf32>
    %c1_22 = arith.constant 1 : index
    %c0_23 = arith.constant 0 : index
    %c0_24 = arith.constant 0 : index
    %49 = vector.load %arg3[%c1_22, %c0_23, %c0_24] : memref<2x16x32xf32, #tpu.memory_space<vmem>>, vector<1x16x32xf32>
    %50 = vector.shape_cast %49 : vector<1x16x32xf32> to vector<16x32xf32>
    %cst_25 = arith.constant dense<0.000000e+00> : vector<32x32xf32>
    %51 = tpu.matmul %48, %50, %cst_25 {dimension_numbers = #tpu.dot_dimension_numbers<[1], [0], [0], [1], [0, 0, 1, 1], [], []>} : vector<32x16xf32>, vector<16x32xf32>, vector<32x32xf32> -> vector<32x32xf32>
    %52 = arith.addf %30, %51 : vector<32x32xf32>
    %cst_26 = arith.constant 0.000000e+00 : f32
    %53 = vector.broadcast %cst_26 : f32 to vector<32x32xf32>
    %54 = arith.maximumf %52, %53 : vector<32x32xf32>
    %55 = vector.shape_cast %54 : vector<32x32xf32> to vector<2x16x32xf32>
    %c0_27 = arith.constant 0 : index
    %c0_28 = arith.constant 0 : index
    %c0_29 = arith.constant 0 : index
    %56 = vector.load %arg4[%c0_27, %c0_28, %c0_29] : memref<2x16x32xf32, #tpu.memory_space<vmem>>, vector<2x16x32xf32>
    tpu.vector_store %arg4[%c0_27, %c0_28, %c0_29], %55 {strides = array<i32>} : memref<2x16x32xf32, #tpu.memory_space<vmem>>, vector<2x16x32xf32>,
    return
  }
  func.func @transform_0(%arg0: i32) -> (i32, i32, i32) {
    %c0_i32 = arith.constant 0 : i32
    %c0_i32_0 = arith.constant 0 : i32
    %c0_i32_1 = arith.constant 0 : i32
    return %arg0, %c0_i32, %c0_i32_0 : i32, i32, i32
  }
  func.func @transform_1(%arg0: i32) -> (i32, i32, i32) {
    %c0_i32 = arith.constant 0 : i32
    %c0_i32_0 = arith.constant 0 : i32
    %c0_i32_1 = arith.constant 0 : i32
    %c0_i32_2 = arith.constant 0 : i32
    return %c0_i32, %c0_i32_0, %c0_i32_1 : i32, i32, i32
  }
  func.func @transform_2(%arg0: i32) -> (i32, i32, i32) {
    %c0_i32 = arith.constant 0 : i32
    %c0_i32_0 = arith.constant 0 : i32
    %c0_i32_1 = arith.constant 0 : i32
    %c0_i32_2 = arith.constant 0 : i32
    return %c0_i32, %c0_i32_0, %c0_i32_1 : i32, i32, i32
  }
  func.func @transform_3(%arg0: i32) -> (i32, i32, i32) {
    %c0_i32 = arith.constant 0 : i32
    %c0_i32_0 = arith.constant 0 : i32
    %c0_i32_1 = arith.constant 0 : i32
    return %arg0, %c0_i32, %c0_i32_0 : i32, i32, i32
  }
}

</mosaic_0001>

<bundles_post_ra>
// kernel: tpu_custom_call.1
= control target key start
LH: loop header
LB: loop body
LE: loop exit
PB: predicated region body
PF: predicated region fallthrough
CT: control target
= control target key end

     0   :  { %v19_v2 = vlaneseq  ;;  %s515_s24 = smov 32   ;;  %s815_s0 = inlined_call_operand.vmem [shape: f32[2,16,32], index: 0, kind: input, shape index: {}]   ;;  %s816_s1 = inlined_call_operand.vmem [shape: f32[2,96,16], index: 1, kind: input, shape index: {}]   ;;  %s817_s2 = inlined_call_operand.vmem [shape: f32[2,16,32], index: 2, kind: input, shape index: {}]   ;;  %s818_s3 = inlined_call_operand.hbm [shape: f32[2,16,32], index: 3, kind: output, shape index: {}]  }
   0x1   :  { %v543_v0 = vld [vmem:[%s815_s0] sm:$0xff]  ;;  %v548_v1 = vld [vmem:[%s815_s0 + $0x8] sm:$0xff]  ;;  %v553_v3 = vld [vmem:[%s815_s0 + $0x10] sm:$0xff] }
   0x2   :  { %v556_v4 = vmax.f32 %v543_v0, 0.0  ;;  %v559_v5 = vmax.f32 %v548_v1, 0.0  ;;  %v562_v6 = vmax.f32 %v553_v3, 0.0  ;;  %v567_v7 = vld [vmem:[%s815_s0 + $0x18] sm:$0xff]  ;;  %v158_v9 = vld [vmem:[%s816_s1 + $0x50] sm:$0xff]  ;;  %v575_v10 = vshrl.u32 %v19_v2, 7 }
   0x3   :  { %v159_v8 = vld [vmem:[%s816_s1 + $0x58] sm:$0xff]  ;;  %v584_v13 = vmax.f32 %v567_v7, 0.0  ;;  %v157_v14 = vld [vmem:[%s816_s1 + $0x48] sm:$0xff] }
   0x4   :  { %177 = vmatpush.msra.mxu0 %v159_v8  ;;  %110 = vrot.lane.b32.xlu0 %v556_v4, %s515_s24  ;;  %v86_v11 = vrot.slane %v559_v5, 1  ;;  %v87_v12 = vrot.slane %v562_v6, 1  ;;  %v85_v15 = vrot.slane %v556_v4, 1  ;;  %vm89_vm0 = vcmp.lt.s32.totalorder %v575_v10, 7 }
   0x5   :  { %112 = vrot.lane.b32.xlu1 %v559_v5, %s515_s24  ;;  %v21_v16 = vadd.s32 8, %v575_v10  ;;  %114 = vrot.lane.b32.xlu2 %v562_v6, %s515_s24 }
   0x6   :  { %178 = vmatpush.msra.mxu0 %v158_v9 }
   0x7   :  { %8 = vsyncpa [#allocation3], 0  ;;  %v23_v17 = vadd.s32 24, %v575_v10  ;;  %v156_v18 = vld [vmem:[%s816_s1 + $0x40] sm:$0xff]  ;;  %v35_v19 = vand.u32 15, %v21_v16  ;;  %v91_v20 = vsel %vm89_vm0, %v86_v11, %v87_v12  ;;  %v88_v21 = vrot.slane %v584_v13, 1 }
   0x8   :  { %179 = vmatpush.msra.mxu0 %v157_v14  ;;  %v155_v22 = vld [vmem:[%s816_s1 + $0x38] sm:$0xff]  ;;  %v92_v23 = vsel %vm89_vm0, %v85_v15, %v86_v11  ;;  %v154_v28 = vld [vmem:[%s816_s1 + $0x30] sm:$0xff]  ;;  %s516_s5 = smov 64   ;;  %v153_v29 = vld [vmem:[%s816_s1 + $0x28] sm:$0xff]  ;;  %v64_v33 = vrot.slane %v556_v4, 7  ;;  %v67_v34 = vrot.slane %v584_v13, 7 }
   0x9   :  { %vm606_vm1 = vcmp.eq.s32.totalorder %v35_v19, 15  ;;  %v49_v26 = vand.u32 15, %v23_v17  ;;  %v90_v27 = vsel %vm89_vm0, %v87_v12, %v88_v21  ;;  %v93_v31 = vsel %vm89_vm0, %v88_v21, %v85_v15  ;;  %v152_v36 = vld [vmem:[%s816_s1 + $0x20] sm:$0xff]  ;;  %v151_v37 = vld [vmem:[%s816_s1 + $0x18] sm:$0xff]  ;;  %v150_v38 = vld [vmem:[%s816_s1 + $0x10] sm:$0xff]  ;;  %s442_s0 = sshll.u32 %s818_s3, 4  ;;  %s443_s0 = int_to_ptr.hbm [resolvable:$true] %s442_s0 }
   0xa   :  { %180 = vmatpush.msra.mxu0 %v156_v18  ;;  %v103_v25 = vsel %vm606_vm1, 0.0, %v91_v20  ;;  %vm68_vm3 = vcmp.lt.s32.totalorder %v575_v10, 1  ;;  %v149_v39 = vld [vmem:[%s816_s1 + $0x8] sm:$0xff]  ;;  %v148_v40 = vld [vmem:[%s816_s1] sm:$0xff]  ;;  %v28_v41 = vand.u32 15, %v575_v10  ;;  %vm138_vm5 = vcmask 261120  }
   0xb   :  { %vm623_vm2 = vcmp.eq.s32.totalorder %v49_v26, 15  ;;  %v72_v35 = vsel %vm68_vm3, %v67_v34, %v64_v33  ;;  %vm143_vm6 = vcmask 523264   ;;  %v65_v46 = vrot.slane %v559_v5, 7  ;;  %v207_v9 = vld [vmem:[%s817_s2 + $0x8] sm:$0xff]  ;;  %v206_v11 = vld [vmem:[%s817_s2] sm:$0xff]  ;;  %v479_v57 = vld [vmem:[%s817_s2 + $0x18] sm:$0xff] }
   0xc   :  { %181 = vmatpush.msra.mxu0 %v155_v22  ;;  %126 = vrot.lane.b32.xlu0 %v92_v23, %s516_s5  ;;  %v105_v32 = vsel %vm623_vm2, 0.0, %v93_v31  ;;  %vm655_vm4 = vcmp.eq.s32.totalorder %v28_v41, 0  ;;  %vm160_vm7 = vcmask 785408   ;;  %v22_v49 = vadd.s32 16, %v575_v10  ;;  %v471_v10 = vld [vmem:[%s816_s1 + $0xa8] sm:$0xff]  ;;  %v470_v30 = vld [vmem:[%s816_s1 + $0xa0] sm:$0xff] }
   0xd   :  { %128 = vrot.lane.b32.xlu1 %v103_v25, %s516_s5  ;;  %130 = vrot.lane.b32.xlu2 %v90_v27, %s516_s5  ;;  %v81_v45 = vsel %vm655_vm4, 0.0, %v72_v35  ;;  %v71_v51 = vsel %vm68_vm3, %v64_v33, %v65_v46  ;;  %v66_v54 = vrot.slane %v562_v6, 7  ;;  %vm208_vm9 = vcmask 130048   ;;  %s518_s25 = smov 128   ;;  %s519_s26 = smov 8  }
   0xe   :  { %182 = vmatpush.msra.mxu0 %v154_v28  ;;  %v42_v52 = vand.u32 15, %v22_v49  ;;  %235 = vmatpush.msra.mxu1 %v207_v9  ;;  %v472_v49 = vld [vmem:[%s816_s1 + $0xb0] sm:$0xff] }
   0xf   :  { %v70_v58 = vsel %vm68_vm3, %v65_v46, %v66_v54  ;;  %v69_v2 = vsel %vm68_vm3, %v66_v54, %v67_v34  ;;  %v465_v54 = vld [vmem:[%s816_s1 + $0x78] sm:$0xff]  ;;  %409 = vmatpush.msra.mxu3 %v479_v57 }
  0x10   :  { %183 = vmatpush.msra.mxu0 %v153_v29  ;;  %vm670_vm8 = vcmp.eq.s32.totalorder %v42_v52, 0  ;;  %236 = vmatpush.msra.mxu1 %v206_v11  ;;  %v467_v52 = vld [vmem:[%s816_s1 + $0x88] sm:$0xff] }
  0x11   :  { %v83_v60 = vsel %vm670_vm8, 0.0, %v70_v58  ;;  %v462_v58 = vld [vmem:[%s816_s1 + $0x60] sm:$0xff] }
  0x12   :  { %184 = vmatpush.msra.mxu0 %v152_v36 }
  0x14   :  { %116 = vrot.lane.b32.xlu0 %v584_v13, %s515_s24  ;;  %185 = vmatpush.msra.mxu0 %v151_v37 }
  0x15   :  { %132 = vrot.lane.b32.xlu1 %v105_v32, %s516_s5 }
  0x16   :  { %186 = vmatpush.msra.mxu0 %v150_v38 }
  0x18   :  { %187 = vmatpush.msra.mxu0 %v149_v39 }
  0x1a   :  { %188 = vmatpush.msra.mxu0 %v148_v40 }
  0x5f   :  { %v115_v53 = vpop.permute.xlu2 %114 }
  0x60   :  { %v141_v61 = vsel %vm138_vm5, %v83_v60, %v115_v53  ;;  %v466_v53 = vld [vmem:[%s816_s1 + $0x80] sm:$0xff] }
  0x67   :  { %v131_v62 = vpop.permute.xlu2 %130 }
  0x68   :  { %v146_v63 = vsel %vm143_vm6, %v141_v61, %v131_v62 }
  0x76   :  { %v111_v42 = vpop.permute.xlu0 %110 }
  0x77   :  { %v113_v44 = vpop.permute.xlu1 %112  ;;  %v139_v47 = vsel %vm138_vm5, %v81_v45, %v111_v42 }
  0x78   :  { %v140_v55 = vsel %vm138_vm5, %v71_v51, %v113_v44  ;;  %v468_v51 = vld [vmem:[%s816_s1 + $0x90] sm:$0xff] }
  0x7e   :  { %v127_v48 = vpop.permute.xlu0 %126 }
  0x7f   :  { %v144_v50 = vsel %vm143_vm6, %v139_v47, %v127_v48  ;;  %v129_v56 = vpop.permute.xlu1 %128  ;;  %v473_v48 = vld [vmem:[%s816_s1 + $0xb8] sm:$0xff] }
  0x80   :  { %454 = vmatmul.msk.f32.vlgmr.msra.gmra.mxu0 %vm160_vm7, %v144_v50  ;;  %v145_v59 = vsel %vm143_vm6, %v140_v55, %v129_v56  ;;  %351 = vmatpush.msra.mxu2 %v473_v48  ;;  %v469_v50 = vld [vmem:[%s816_s1 + $0x98] sm:$0xff]  ;;  %v464_v55 = vld [vmem:[%s816_s1 + $0x70] sm:$0xff]  ;;  %v463_v56 = vld [vmem:[%s816_s1 + $0x68] sm:$0xff] }
  0x82   :  { %352 = vmatpush.msra.mxu2 %v472_v49 }
  0x84   :  { %353 = vmatpush.msra.mxu2 %v471_v10 }
  0x86   :  { %v117_v4 = vpop.permute.xlu0 %116  ;;  %354 = vmatpush.msra.mxu2 %v470_v30 }
  0x87   :  { %v142_v5 = vsel %vm138_vm5, %v69_v2, %v117_v4  ;;  %v133_v6 = vpop.permute.xlu1 %132 }
  0x88   :  { %455 = vmatmul.msk.f32.gmra.mxu0 %vm160_vm7, %v145_v59  ;;  %v147_v8 = vsel %vm143_vm6, %v142_v5, %v133_v6  ;;  %355 = vmatpush.msra.mxu2 %v469_v50 }
  0x8a   :  { %356 = vmatpush.msra.mxu2 %v468_v51 }
  0x8c   :  { %357 = vmatpush.msra.mxu2 %v467_v52 }
  0x8e   :  { %358 = vmatpush.msra.mxu2 %v466_v53 }
  0x90   :  { %456 = vmatmul.msk.f32.gmra.mxu0 %vm160_vm7, %v146_v63  ;;  %359 = vmatpush.msra.mxu2 %v465_v54 }
  0x92   :  { %360 = vmatpush.msra.mxu2 %v464_v55 }
  0x94   :  { %361 = vmatpush.msra.mxu2 %v463_v56 }
  0x96   :  { %362 = vmatpush.msra.mxu2 %v462_v58 }
  0x98   :  { %457 = vmatmul.msk.f32.gmra.mxu0 %vm160_vm7, %v147_v8 }
  0xfd   :  { %v190_v12 = vpop.f32.mrf.mxu0 }
  0xfe   :  { %v202_v13 = vmax.f32 %v190_v12, 0.0 }
 0x100   :  { %458 = vmatmul.msk.f32.vlgmr.msra.gmra.mxu1 %vm208_vm9, %v202_v13 }
 0x105   :  { %v193_v14 = vpop.f32.mrf.mxu0 }
 0x106   :  { %v203_v15 = vmax.f32 %v193_v14, 0.0 }
 0x108   :  { %459 = vmatmul.msk.f32.gmra.mxu1 %vm208_vm9, %v203_v15 }
 0x10d   :  { %v196_v16 = vpop.f32.mrf.mxu0 }
 0x10e   :  { %v204_v17 = vmax.f32 %v196_v16, 0.0 }
 0x110   :  { %460 = vmatmul.msk.f32.gmra.mxu1 %vm208_vm9, %v204_v17  ;;  %v478_v17 = vld [vmem:[%s817_s2 + $0x10] sm:$0xff]  ;;  %s517_s2 = smov [#allocation2]  }
 0x111   :  { %410 = vmatpush.msra.mxu3 %v478_v17  ;;  %s440_s21 = sshll.u32 %s517_s2, 4  ;;  %s441_s21 = int_to_ptr.vmem [resolvable:$true] %s440_s21 }
 0x115   :  { %v199_v18 = vpop.f32.mrf.mxu0 }
 0x116   :  { %v205_v19 = vmax.f32 %v199_v18, 0.0 }
 0x118   :  { %461 = vmatmul.msk.f32.gmra.mxu1 %vm208_vm9, %v205_v19 }
 0x17d   :  { %v238_v20 = vpop.f32.mrf.mxu1 }
 0x17e   :  { %v699_v21 = vadd.f32 %v238_v20, %v543_v0 }
 0x180   :  { %v254_v22 = vmax.f32 %v699_v21, 0.0 }
 0x182   :  { %286 = vrot.lane.b32.xlu2 %v254_v22, %s515_s24  ;;  %v258_v27 = vrot.slane %v254_v22, 7  ;;  %v270_v29 = vrot.slane %v254_v22, 1 }
 0x185   :  { %v241_v23 = vpop.f32.mrf.mxu1 }
 0x186   :  { %v704_v25 = vadd.f32 %v241_v23, %v548_v1 }
 0x188   :  { %v255_v26 = vmax.f32 %v704_v25, 0.0 }
 0x18a   :  { %v259_v28 = vrot.slane %v255_v26, 7  ;;  %288 = vrot.lane.b32.xlu1 %v255_v26, %s515_s24  ;;  %v271_v31 = vrot.slane %v255_v26, 1 }
 0x18c   :  { %v276_v0 = vsel %vm89_vm0, %v270_v29, %v271_v31  ;;  %v264_v32 = vsel %vm68_vm3, %v258_v27, %v259_v28 }
 0x18d   :  { %302 = vrot.lane.b32.xlu0 %v276_v0, %s516_s5  ;;  %v244_v33 = vpop.f32.mrf.mxu1 }
 0x18e   :  { %v714_v1 = vadd.f32 %v244_v33, %v553_v3 }
 0x190   :  { %v256_v34 = vmax.f32 %v714_v1, 0.0 }
 0x192   :  { %v260_v35 = vrot.slane %v256_v34, 7  ;;  %v272_v36 = vrot.slane %v256_v34, 1 }
 0x194   :  { %v275_v37 = vsel %vm89_vm0, %v271_v31, %v272_v36  ;;  %v263_v38 = vsel %vm68_vm3, %v259_v28, %v260_v35 }
 0x195   :  { %290 = vrot.lane.b32.xlu0 %v256_v34, %s515_s24  ;;  %v247_v39 = vpop.f32.mrf.mxu1  ;;  %v279_v40 = vsel %vm606_vm1, 0.0, %v275_v37  ;;  %v268_v43 = vsel %vm670_vm8, 0.0, %v263_v38 }
 0x196   :  { %v725_v41 = vadd.f32 %v247_v39, %v567_v7  ;;  %304 = vrot.lane.b32.xlu2 %v279_v40, %s516_s5 }
 0x198   :  { %v257_v3 = vmax.f32 %v725_v41, 0.0 }
 0x19a   :  { %v261_v42 = vrot.slane %v257_v3, 7  ;;  %v273_v44 = vrot.slane %v257_v3, 1 }
 0x19c   :  { %v274_v45 = vsel %vm89_vm0, %v272_v36, %v273_v44  ;;  %v277_v46 = vsel %vm89_vm0, %v273_v44, %v270_v29  ;;  %v265_v47 = vsel %vm68_vm3, %v261_v42, %v258_v27  ;;  %v262_v24 = vsel %vm68_vm3, %v260_v35, %v261_v42 }
 0x19d   :  { %306 = vrot.lane.b32.xlu1 %v274_v45, %s516_s5  ;;  %v281_v7 = vsel %vm623_vm2, 0.0, %v277_v46  ;;  %v266_v60 = vsel %vm655_vm4, 0.0, %v265_v47 }
 0x19e   :  { %292 = vrot.lane.b32.xlu2 %v257_v3, %s515_s24  ;;  %308 = vrot.lane.b32.xlu0 %v281_v7, %s516_s5 }
 0x1dc   :  { %v287_v59 = vpop.permute.xlu2 %286 }
 0x1dd   :  { %v314_v61 = vsel %vm138_vm5, %v266_v60, %v287_v59 }
 0x1f0   :  { %v305_v5 = vpop.permute.xlu2 %304 }
 0x1f8   :  { %v293_v13 = vpop.permute.xlu2 %292 }
 0x1f9   :  { %v317_v15 = vsel %vm138_vm5, %v262_v24, %v293_v13 }
 0x1fc   :  { %v289_v2 = vpop.permute.xlu1 %288 }
 0x1fd   :  { %v315_v4 = vsel %vm138_vm5, %v264_v32, %v289_v2 }
 0x1fe   :  { %v319_v6 = vsel %vm143_vm6, %v315_v4, %v305_v5 }
 0x1ff   :  { %v303_v62 = vpop.permute.xlu0 %302 }
 0x200   :  { %v318_v63 = vsel %vm143_vm6, %v314_v61, %v303_v62 }
 0x201   :  { %474 = vmatmul.msk.f32.vlgmr.msra.gmra.mxu2 %vm160_vm7, %v318_v63 }
 0x207   :  { %v291_v8 = vpop.permute.xlu0 %290 }
 0x208   :  { %v316_v9 = vsel %vm138_vm5, %v268_v43, %v291_v8 }
 0x209   :  { %475 = vmatmul.msk.f32.gmra.mxu2 %vm160_vm7, %v319_v6 }
 0x20f   :  { %v307_v11 = vpop.permute.xlu1 %306 }
 0x210   :  { %v320_v12 = vsel %vm143_vm6, %v316_v9, %v307_v11  ;;  %v309_v14 = vpop.permute.xlu0 %308 }
 0x211   :  { %476 = vmatmul.msk.f32.gmra.mxu2 %vm160_vm7, %v320_v12  ;;  %v321_v16 = vsel %vm143_vm6, %v317_v15, %v309_v14 }
 0x219   :  { %477 = vmatmul.msk.f32.gmra.mxu2 %vm160_vm7, %v321_v16 }
 0x284   :  { %v364_v18 = vpop.f32.mrf.mxu2 }
 0x285   :  { %v376_v19 = vmax.f32 %v364_v18, 0.0 }
 0x287   :  { %480 = vmatmul.msk.f32.vlgmr.msra.gmra.mxu3 %vm208_vm9, %v376_v19 }
 0x28c   :  { %v367_v20 = vpop.f32.mrf.mxu2 }
 0x28d   :  { %v377_v22 = vmax.f32 %v367_v20, 0.0 }
 0x28f   :  { %481 = vmatmul.msk.f32.gmra.mxu3 %vm208_vm9, %v377_v22 }
 0x294   :  { %v370_v23 = vpop.f32.mrf.mxu2 }
 0x295   :  { %v378_v26 = vmax.f32 %v370_v23, 0.0 }
 0x297   :  { %482 = vmatmul.msk.f32.gmra.mxu3 %vm208_vm9, %v378_v26 }
 0x29c   :  { %v373_v27 = vpop.f32.mrf.mxu2 }
 0x29d   :  { %v379_v28 = vmax.f32 %v373_v27, 0.0 }
 0x29f   :  { %483 = vmatmul.msk.f32.gmra.mxu3 %vm208_vm9, %v379_v28 }
 0x30a   :  { %v412_v29 = vpop.f32.mrf.mxu3 }
 0x30b   :  { %v424_v31 = vadd.f32 %v412_v29, %v699_v21 }
 0x30d   :  { %v428_v0 = vmax.f32 %v424_v31, 0.0 }
 0x30f   :  { %432 = vst.msk [vmem:[#allocation2] sm:$0xff] %vm138_vm5, %v428_v0 }
 0x312   :  { %v415_v32 = vpop.f32.mrf.mxu3 }
 0x313   :  { %v425_v33 = vadd.f32 %v415_v32, %v704_v25 }
 0x315   :  { %v429_v34 = vmax.f32 %v425_v33, 0.0 }
 0x317   :  { %433 = vst.msk [vmem:[#allocation2 + $0x8] sm:$0xff] %vm138_vm5, %v429_v34 }
 0x31a   :  { %v418_v35 = vpop.f32.mrf.mxu3 }
 0x31b   :  { %v426_v36 = vadd.f32 %v418_v35, %v714_v1 }
 0x31d   :  { %v430_v37 = vmax.f32 %v426_v36, 0.0 }
 0x31f   :  { %434 = vst.msk [vmem:[#allocation2 + $0x10] sm:$0xff] %vm138_vm5, %v430_v37 }
 0x322   :  { %v421_v21 = vpop.f32.mrf.mxu3 }
 0x323   :  { %v427_v38 = vadd.f32 %v421_v21, %v725_v41 }
 0x325   :  { %v431_v25 = vmax.f32 %v427_v38, 0.0 }
 0x327   :  { %435 = vst.msk [vmem:[#allocation2 + $0x18] sm:$0xff] %vm138_vm5, %v431_v25 }
 0x328   :  { %448 = dma.vmem_to_hbm [thread:$0]  %s441_s21, 512, %s443_s0, [#allocation3], %s518_s25, %s518_s25, %s519_s26  }
 0x329   :  { %513 = dma.done.wait [#allocation3], 512  }
 0x32a   :  { %514 = vsyncadd [#allocation3], 4294966784 }
 0x32b   :  { %453 = vsyncpa [#allocation3], 1 }

</bundles_post_ra>
